<compile_context>
chip_gen: v7x
topology: tpu7x:2x2x1
jax: 0.10.0
libtpu: 0.0.40
codegen_flags: <defaults>
</compile_context>

<pallas_src>
import jax
import jax.numpy as jnp
from jax import lax
from jax.experimental import pallas as pl
from jax.experimental.pallas import tpu as pltpu


def make_bow_kernel(pad_idx: int, seq_len: int, vocab: int):
    def bow_kernel(xs_ref, emb_ref, wT_ref, b_ref, out_ref):
        # xs_ref : (TB, T)  int32   token ids for this row tile (only streamed input)
        # emb_ref: (V, E)   float32 embedding table            (VMEM-resident)
        # wT_ref : (E, H)   float32 linear weight, transposed  (VMEM-resident)
        # b_ref  : (1, H)   float32 linear bias                (VMEM-resident)
        # out_ref: (TB, H)  float32 encoded output
        ids = xs_ref[...]                                          # (TB, T)
        tb = ids.shape[0]

        # Per-row token histogram over the vocab, built with lane-safe 2D ops
        # (static lane slice + lane-broadcast compare).  Counts are exact ints.
        iota_v = lax.broadcasted_iota(jnp.int32, (tb, vocab), 1)   # (TB, V)
        hist = jnp.zeros((tb, vocab), jnp.float32)
        for t in range(seq_len):                                   # T is small/static
            tok = ids[:, t:t + 1]                                  # (TB, 1)
            hist = hist + (tok == iota_v).astype(jnp.float32)      # (TB, V)

        # sum_t emb[x_t]  ==  hist @ emb   (exact, pad rows included just like
        # the PyTorch gather-then-sum).
        e_sum = jnp.dot(hist, emb_ref[...],
                        preferred_element_type=jnp.float32)        # (TB, E)

        # (sum_t x_t) @ W^T + T*b : bias hits every token, pads included.
        y = jnp.dot(e_sum, wT_ref[...],
                    preferred_element_type=jnp.float32)            # (TB, H)
        y = y + jnp.float32(seq_len) * b_ref[...]

        # Non-pad count, clamped at 1 (reuse the histogram's pad column).
        cnt = jnp.maximum(jnp.float32(seq_len)
                          - hist[:, pad_idx:pad_idx + 1], 1.0)     # (TB, 1)
        out_ref[...] = y / cnt

    return bow_kernel


def _row_tile(batch: int, max_rows: int = 128) -> int:
    """Rows per grid step: whole batch if small, else a multiple of 8 dividing B."""
    if batch <= max_rows or batch % 8 != 0:
        # TODO(synk): pad odd large batches to a multiple of 8 instead of one big block.
        return batch
    tb = (min(max_rows, batch) // 8) * 8
    while batch % tb != 0:
        tb -= 8
    return tb


def bow_encoder_forward(xs, emb_weight, lin_weight, lin_bias, pad_idx):
    """xs: (B,T) int32; emb_weight: (V,E); lin_weight: (H,E); lin_bias: (H,)."""
    B, T = xs.shape
    V, E = emb_weight.shape
    H = lin_weight.shape[0]
    TB = _row_tile(B)

    wT = lin_weight.T.astype(jnp.float32)              # (E, H)
    b2d = lin_bias.reshape(1, H).astype(jnp.float32)   # (1, H)

    kernel = make_bow_kernel(pad_idx, T, V)
    return pl.pallas_call(
        kernel,
        out_shape=jax.ShapeDtypeStruct((B, H), jnp.float32),
        grid_spec=pltpu.PrefetchScalarGridSpec(
            num_scalar_prefetch=0,
            grid=(B // TB,),
            in_specs=[
                pl.BlockSpec((TB, T), lambda i: (i, 0)),   # token ids (streamed)
                pl.BlockSpec((V, E), lambda i: (0, 0)),    # embedding table (resident)
                pl.BlockSpec((E, H), lambda i: (0, 0)),    # W^T (resident)
                pl.BlockSpec((1, H), lambda i: (0, 0)),    # bias (resident)
            ],
            out_specs=pl.BlockSpec((TB, H), lambda i: (i, 0)),
        ),
        compiler_params=pltpu.CompilerParams(
            dimension_semantics=("parallel",),             # row tiles split across TCs
            vmem_limit_bytes=32 * 1024 * 1024,             # safe on v5e/v6e/v7x
        ),
    )(xs.astype(jnp.int32), emb_weight.astype(jnp.float32), wT, b2d)


if __name__ == "__main__":
    # Small shapes consistent with the module config.
    B, T = 2, 8            # batch, sequence length
    V = 16                 # vocab size (len(tok2i))
    E = 32                 # word_emb_dim
    H = 64                 # dec_lstm_dim (output_size)
    PAD = 0                # tok2i['<p>']

    key = jax.random.PRNGKey(0)
    k_emb, k_w, k_b, k_xs = jax.random.split(key, 4)

    # nn.Embedding init ~ N(0,1); padding_idx row zeroed (as nn.Embedding does).
    emb_weight = jax.random.normal(k_emb, (V, E), dtype=jnp.float32)
    emb_weight = emb_weight.at[PAD].set(0.0)

    # nn.Linear init ~ U(-1/sqrt(E), 1/sqrt(E)).
    bound = 1.0 / (E ** 0.5)
    lin_weight = jax.random.uniform(k_w, (H, E), dtype=jnp.float32,
                                    minval=-bound, maxval=bound)
    lin_bias = jax.random.uniform(k_b, (H,), dtype=jnp.float32,
                                  minval=-bound, maxval=bound)

    # Token ids with some pads (id 0).
    xs = jax.random.randint(k_xs, (B, T), 0, V, dtype=jnp.int32)
    xs = xs.at[0, T - 2:].set(PAD)   # inject padding in row 0

    enc = bow_encoder_forward(xs, emb_weight, lin_weight, lin_bias, PAD)
    enc = jax.block_until_ready(enc)

    # Pure-JAX reference mirroring the PyTorch forward exactly.
    xes_ref = emb_weight[xs]                                   # (B,T,E)
    y_ref = jnp.einsum("bte,he->bth", xes_ref, lin_weight) + lin_bias
    cnt = jnp.maximum((xs != PAD).sum(1, keepdims=True).astype(jnp.float32), 1.0)
    enc_ref = y_ref.sum(1) / cnt
    assert enc.shape == (B, H)
    assert jnp.allclose(enc, enc_ref, atol=1e-4, rtol=1e-4)

    print("KERNEL_OK")
</pallas_src>

<mosaic_0001>
module attributes {stable_mosaic.version = 11 : i64} {
  func.func @bow_kernel(%arg0: i32, %arg1: memref<2x8xi32, #tpu.memory_space<vmem>>, %arg2: memref<16x32xf32, #tpu.memory_space<vmem>>, %arg3: memref<32x64xf32, #tpu.memory_space<vmem>>, %arg4: memref<1x64xf32, #tpu.memory_space<vmem>>, %arg5: memref<2x64xf32, #tpu.memory_space<vmem>>) attributes {dimension_semantics = [#tpu.dimension_semantics<parallel>], iteration_bounds = array<i64: 1>, scalar_prefetch = 0 : i64, scratch_operands = 0 : i64, tpu.core_type = #tpu.core_type<tc>, window_params = [{transform_indices = @transform_0, window_bounds = array<i64: 2, 8>}, {pipeline_mode = #tpu.pipeline_mode<synchronous>, transform_indices = @transform_1, window_bounds = array<i64: 16, 32>}, {pipeline_mode = #tpu.pipeline_mode<synchronous>, transform_indices = @transform_2, window_bounds = array<i64: 32, 64>}, {pipeline_mode = #tpu.pipeline_mode<synchronous>, transform_indices = @transform_3, window_bounds = array<i64: 1, 64>}, {transform_indices = @transform_4, window_bounds = array<i64: 2, 64>}]} {
    %c0 = arith.constant 0 : index
    %c0_0 = arith.constant 0 : index
    %0 = vector.load %arg1[%c0, %c0_0] : memref<2x8xi32, #tpu.memory_space<vmem>>, vector<2x8xi32>
    %1 = tpu.iota {dimensions = array<i32: 1>} : vector<2x16xi32>
    %cst = arith.constant 0.000000e+00 : f32
    %2 = vector.broadcast %cst : f32 to vector<2x16xf32>
    %3 = vector.extract_strided_slice %0 {offsets = [0, 0], sizes = [2, 1], strides = [1, 1]} : vector<2x8xi32> to vector<2x1xi32>
    %4 = vector.broadcast %3 : vector<2x1xi32> to vector<2x16xi32>
    %5 = arith.cmpi eq, %4, %1 : vector<2x16xi32>
    %6 = arith.extui %5 : vector<2x16xi1> to vector<2x16xi32>
    %7 = arith.sitofp %6 : vector<2x16xi32> to vector<2x16xf32>
    %8 = arith.addf %2, %7 : vector<2x16xf32>
    %9 = vector.extract_strided_slice %0 {offsets = [0, 1], sizes = [2, 1], strides = [1, 1]} : vector<2x8xi32> to vector<2x1xi32>
    %10 = vector.broadcast %9 : vector<2x1xi32> to vector<2x16xi32>
    %11 = arith.cmpi eq, %10, %1 : vector<2x16xi32>
    %12 = arith.extui %11 : vector<2x16xi1> to vector<2x16xi32>
    %13 = arith.sitofp %12 : vector<2x16xi32> to vector<2x16xf32>
    %14 = arith.addf %8, %13 : vector<2x16xf32>
    %15 = vector.extract_strided_slice %0 {offsets = [0, 2], sizes = [2, 1], strides = [1, 1]} : vector<2x8xi32> to vector<2x1xi32>
    %16 = vector.broadcast %15 : vector<2x1xi32> to vector<2x16xi32>
    %17 = arith.cmpi eq, %16, %1 : vector<2x16xi32>
    %18 = arith.extui %17 : vector<2x16xi1> to vector<2x16xi32>
    %19 = arith.sitofp %18 : vector<2x16xi32> to vector<2x16xf32>
    %20 = arith.addf %14, %19 : vector<2x16xf32>
    %21 = vector.extract_strided_slice %0 {offsets = [0, 3], sizes = [2, 1], strides = [1, 1]} : vector<2x8xi32> to vector<2x1xi32>
    %22 = vector.broadcast %21 : vector<2x1xi32> to vector<2x16xi32>
    %23 = arith.cmpi eq, %22, %1 : vector<2x16xi32>
    %24 = arith.extui %23 : vector<2x16xi1> to vector<2x16xi32>
    %25 = arith.sitofp %24 : vector<2x16xi32> to vector<2x16xf32>
    %26 = arith.addf %20, %25 : vector<2x16xf32>
    %27 = vector.extract_strided_slice %0 {offsets = [0, 4], sizes = [2, 1], strides = [1, 1]} : vector<2x8xi32> to vector<2x1xi32>
    %28 = vector.broadcast %27 : vector<2x1xi32> to vector<2x16xi32>
    %29 = arith.cmpi eq, %28, %1 : vector<2x16xi32>
    %30 = arith.extui %29 : vector<2x16xi1> to vector<2x16xi32>
    %31 = arith.sitofp %30 : vector<2x16xi32> to vector<2x16xf32>
    %32 = arith.addf %26, %31 : vector<2x16xf32>
    %33 = vector.extract_strided_slice %0 {offsets = [0, 5], sizes = [2, 1], strides = [1, 1]} : vector<2x8xi32> to vector<2x1xi32>
    %34 = vector.broadcast %33 : vector<2x1xi32> to vector<2x16xi32>
    %35 = arith.cmpi eq, %34, %1 : vector<2x16xi32>
    %36 = arith.extui %35 : vector<2x16xi1> to vector<2x16xi32>
    %37 = arith.sitofp %36 : vector<2x16xi32> to vector<2x16xf32>
    %38 = arith.addf %32, %37 : vector<2x16xf32>
    %39 = vector.extract_strided_slice %0 {offsets = [0, 6], sizes = [2, 1], strides = [1, 1]} : vector<2x8xi32> to vector<2x1xi32>
    %40 = vector.broadcast %39 : vector<2x1xi32> to vector<2x16xi32>
    %41 = arith.cmpi eq, %40, %1 : vector<2x16xi32>
    %42 = arith.extui %41 : vector<2x16xi1> to vector<2x16xi32>
    %43 = arith.sitofp %42 : vector<2x16xi32> to vector<2x16xf32>
    %44 = arith.addf %38, %43 : vector<2x16xf32>
    %45 = vector.extract_strided_slice %0 {offsets = [0, 7], sizes = [2, 1], strides = [1, 1]} : vector<2x8xi32> to vector<2x1xi32>
    %46 = vector.broadcast %45 : vector<2x1xi32> to vector<2x16xi32>
    %47 = arith.cmpi eq, %46, %1 : vector<2x16xi32>
    %48 = arith.extui %47 : vector<2x16xi1> to vector<2x16xi32>
    %49 = arith.sitofp %48 : vector<2x16xi32> to vector<2x16xf32>
    %50 = arith.addf %44, %49 : vector<2x16xf32>
    %c0_1 = arith.constant 0 : index
    %c0_2 = arith.constant 0 : index
    %51 = vector.load %arg2[%c0_1, %c0_2] : memref<16x32xf32, #tpu.memory_space<vmem>>, vector<16x32xf32>
    %cst_3 = arith.constant dense<0.000000e+00> : vector<2x32xf32>
    %52 = tpu.matmul %50, %51, %cst_3 {dimension_numbers = #tpu.dot_dimension_numbers<[1], [0], [0], [1], [0, 0, 1, 1], [], []>} : vector<2x16xf32>, vector<16x32xf32>, vector<2x32xf32> -> vector<2x32xf32>
    %c0_4 = arith.constant 0 : index
    %c0_5 = arith.constant 0 : index
    %53 = vector.load %arg3[%c0_4, %c0_5] : memref<32x64xf32, #tpu.memory_space<vmem>>, vector<32x64xf32>
    %cst_6 = arith.constant dense<0.000000e+00> : vector<2x64xf32>
    %54 = tpu.matmul %52, %53, %cst_6 {dimension_numbers = #tpu.dot_dimension_numbers<[1], [0], [0], [1], [0, 0, 1, 1], [], []>} : vector<2x32xf32>, vector<32x64xf32>, vector<2x64xf32> -> vector<2x64xf32>
    %c0_7 = arith.constant 0 : index
    %c0_8 = arith.constant 0 : index
    %55 = vector.load %arg4[%c0_7, %c0_8] : memref<1x64xf32, #tpu.memory_space<vmem>>, vector<1x64xf32>
    %cst_9 = arith.constant 8.000000e+00 : f32
    %56 = vector.broadcast %cst_9 : f32 to vector<1x64xf32>
    %57 = arith.mulf %56, %55 : vector<1x64xf32>
    %58 = vector.broadcast %57 : vector<1x64xf32> to vector<2x64xf32>
    %59 = arith.addf %54, %58 : vector<2x64xf32>
    %60 = vector.extract_strided_slice %50 {offsets = [0, 0], sizes = [2, 1], strides = [1, 1]} : vector<2x16xf32> to vector<2x1xf32>
    %cst_10 = arith.constant 8.000000e+00 : f32
    %61 = vector.broadcast %cst_10 : f32 to vector<2x1xf32>
    %62 = arith.subf %61, %60 : vector<2x1xf32>
    %cst_11 = arith.constant 1.000000e+00 : f32
    %63 = vector.broadcast %cst_11 : f32 to vector<2x1xf32>
    %64 = arith.maximumf %62, %63 : vector<2x1xf32>
    %65 = vector.broadcast %64 : vector<2x1xf32> to vector<2x64xf32>
    %66 = arith.divf %59, %65 : vector<2x64xf32>
    %c0_12 = arith.constant 0 : index
    %c0_13 = arith.constant 0 : index
    %67 = vector.load %arg5[%c0_12, %c0_13] : memref<2x64xf32, #tpu.memory_space<vmem>>, vector<2x64xf32>
    tpu.vector_store %arg5[%c0_12, %c0_13], %66 {strides = array<i32>} : memref<2x64xf32, #tpu.memory_space<vmem>>, vector<2x64xf32>,
    return
  }
  func.func @transform_0(%arg0: i32) -> (i32, i32) {
    %c0_i32 = arith.constant 0 : i32
    %c0_i32_0 = arith.constant 0 : i32
    return %arg0, %c0_i32 : i32, i32
  }
  func.func @transform_1(%arg0: i32) -> (i32, i32) {
    %c0_i32 = arith.constant 0 : i32
    %c0_i32_0 = arith.constant 0 : i32
    %c0_i32_1 = arith.constant 0 : i32
    return %c0_i32, %c0_i32_0 : i32, i32
  }
  func.func @transform_2(%arg0: i32) -> (i32, i32) {
    %c0_i32 = arith.constant 0 : i32
    %c0_i32_0 = arith.constant 0 : i32
    %c0_i32_1 = arith.constant 0 : i32
    return %c0_i32, %c0_i32_0 : i32, i32
  }
  func.func @transform_3(%arg0: i32) -> (i32, i32) {
    %c0_i32 = arith.constant 0 : i32
    %c0_i32_0 = arith.constant 0 : i32
    %c0_i32_1 = arith.constant 0 : i32
    return %c0_i32, %c0_i32_0 : i32, i32
  }
  func.func @transform_4(%arg0: i32) -> (i32, i32) {
    %c0_i32 = arith.constant 0 : i32
    %c0_i32_0 = arith.constant 0 : i32
    return %arg0, %c0_i32 : i32, i32
  }
}

</mosaic_0001>

<bundles_post_ra>
// kernel: tpu_custom_call.1
= control target key start
LH: loop header
LB: loop body
LE: loop exit
PB: predicated region body
PF: predicated region fallthrough
CT: control target
= control target key end

     0   :  { %9 = vsyncpa [#allocation3], 0  ;;  %s571_s0 = inlined_call_operand.hbm [shape: s32[2,8], index: 0, kind: input, shape index: {}]   ;;  %s572_s1 = inlined_call_operand.hbm [shape: f32[16,32], index: 1, kind: input, shape index: {}]   ;;  %s573_s2 = inlined_call_operand.hbm [shape: f32[32,64], index: 2, kind: input, shape index: {}]   ;;  %s574_s3 = inlined_call_operand.vmem [shape: f32[1,64], index: 3, kind: input, shape index: {}]   ;;  %s575_s4 = inlined_call_operand.hbm [shape: f32[2,64], index: 4, kind: output, shape index: {}]  }
   0x1   :  { %10 = vsyncpa [#allocation6], 0 }
   0x2   :  { %11 = vsyncpa [#allocation4], 0  ;;  %s472_s15 = smov [#allocation5]   ;;  %s378_s19 = scalar_lea.hbm %s572_s1, 256 }
   0x3   :  { %s27_s16 = sshll.u32 %s472_s15, 4  ;;  %p379_p0 = scmp.ne.s32.totalorder %s572_s1, %s378_s19  ;;  %s28_s16 = int_to_ptr.vmem [resolvable:$true] %s27_s16 }
   0x4   :  { %p382_p1 = scmp.lt.u32.totalorder %s378_s19, %s572_s1 }
   0x6   :  { %p384_p2 = pnand %p382_p1, %p379_p0 }
   0x8   :  { %387 = shalt.err (!%p384_p2)
}
   0x9   :  { %s388_s24 = scalar_lea.vmem %s28_s16, 256  ;;  %p393_p4 = scmp.lt.s32.totalorder %s28_s16, %s28_s16 }
   0xa   :  { %p389_p3 = scmp.ne.s32.totalorder %s28_s16, %s388_s24  ;;  %p394_p5 = scmp.lt.s32.totalorder %s388_s24, %s388_s24 }
   0xc   :  { %p395_p6 = por %p394_p5, %p393_p4 }
   0xe   :  { %p396_p7 = pnand %p395_p6, %p389_p3 }
  0x10   :  { %399 = shalt.err (!%p396_p7)
}
  0x11   :  { %s473_s25 = smov 128   ;;  %s474_s26 = smov 8  }
  0x12   :  { %33 = dma.hbm_to_vmem [thread:$0]  %s572_s1, 256, %s28_s16, [#allocation6], %s473_s25, %s473_s25, %s474_s26  }
  0x13   :  { %s475_s29 = smov [#allocation2]   ;;  %s476_s5 = smov [#allocation7]  }
  0x14   :  { %s18_s30 = sshll.u32 %s475_s29, 4  ;;  %s39_s6 = sshll.u32 %s476_s5, 4  ;;  %s19_s30 = int_to_ptr.vmem [resolvable:$true] %s18_s30  ;;  %s40_s6 = int_to_ptr.vmem [resolvable:$true] %s39_s6 }
  0x15   :  { %s400_s9 = scalar_lea.hbm %s571_s0, 32 }
  0x16   :  { %p401_p8 = scmp.ne.s32.totalorder %s571_s0, %s400_s9  ;;  %p404_p9 = scmp.lt.u32.totalorder %s400_s9, %s571_s0 }
  0x18   :  { %p406_p10 = pnand %p404_p9, %p401_p8 }
  0x1a   :  { %409 = shalt.err (!%p406_p10)
}
  0x1b   :  { %s410_s1 = scalar_lea.vmem %s19_s30, 32  ;;  %p415_p12 = scmp.lt.s32.totalorder %s19_s30, %s19_s30 }
  0x1c   :  { %p411_p11 = scmp.ne.s32.totalorder %s19_s30, %s410_s1  ;;  %p416_p13 = scmp.lt.s32.totalorder %s410_s1, %s410_s1 }
  0x1e   :  { %p417_p0 = por %p416_p13, %p415_p12 }
  0x20   :  { %p418_p1 = pnand %p417_p0, %p411_p11 }
  0x22   :  { %421 = shalt.err (!%p418_p1)
}
  0x23   :  { %21 = dma.hbm_to_vmem [thread:$0]  %s571_s0, 32, %s19_s30, [#allocation3]  }
  0x24   :  { %s422_s18 = scalar_lea.hbm %s573_s2, 512 }
  0x25   :  { %p423_p2 = scmp.ne.s32.totalorder %s573_s2, %s422_s18  ;;  %p426_p3 = scmp.lt.u32.totalorder %s422_s18, %s573_s2 }
  0x27   :  { %p428_p4 = pnand %p426_p3, %p423_p2 }
  0x29   :  { %431 = shalt.err (!%p428_p4)
}
  0x2a   :  { %s432_s23 = scalar_lea.vmem %s40_s6, 512  ;;  %p437_p6 = scmp.lt.s32.totalorder %s40_s6, %s40_s6 }
  0x2b   :  { %p433_p5 = scmp.ne.s32.totalorder %s40_s6, %s432_s23  ;;  %p438_p7 = scmp.lt.s32.totalorder %s432_s23, %s432_s23 }
  0x2d   :  { %p439_p8 = por %p438_p7, %p437_p6 }
  0x2f   :  { %p440_p9 = pnand %p439_p8, %p433_p5 }
  0x31   :  { %443 = shalt.err (!%p440_p9)
}
  0x32   :  { %45 = dma.hbm_to_vmem [thread:$0]  %s573_s2, 512, %s40_s6, [#allocation6], %s473_s25, %s473_s25, %s474_s26  }
  0x33   :  { %466 = dma.done.wait [#allocation3], 32  }
  0x34   :  { %467 = vsyncadd [#allocation3], 4294967264 }
  0x35   :  { %468 = dma.done.wait [#allocation6], 768  }
  0x36   :  { %469 = vsyncadd [#allocation6], 4294966528  ;;  %v477_v0 = vmov 2   ;;  %v478_v1 = vmov 0   ;;  %v57_v2 = vld [vmem:[#allocation2] sm:$0x3]  ;;  %v58_v14 = vlaneseq }
  0x37   :  { %369 = vset.pattern.permute.xlu1 %v477_v0  ;;  %367 = vset.pattern.permute.xlu0 %v478_v1  ;;  %v479_v3 = vmov 3   ;;  %v480_v4 = vmov 1   ;;  %v481_v5 = vmov 4   ;;  %v482_v6 = vmov 5   ;;  %v116_v8 = vld [vmem:[#allocation5] sm:$0xff]  ;;  %v117_v9 = vld [vmem:[#allocation5 + $0x8] sm:$0xff] }
  0x38   :  { %75 = vperm.xlu1 %369, %v57_v2   ;;  %61 = vperm.xlu0 %367, %v57_v2   ;;  %v483_v7 = vmov 6   ;;  %v484_v10 = vmov 7   ;;  %v342_v11 = vpack.c.bf16 %v117_v9, %v116_v8  ;;  %v485_v12 = vmov 0.0|0.0   ;;  %v192_v41 = vld [vmem:[#allocation7] sm:$0xff]  ;;  %v193_v42 = vld [vmem:[#allocation7 + $0x8] sm:$0xff]  ;;  %v194_v43 = vld [vmem:[#allocation7 + $0x10] sm:$0xff] }
  0x39   :  { %341 = vmatprep.subr.bf16.mxu0 %v485_v12  ;;  %344 = vmatprep.subr.bf16.mxu1 %v485_v12  ;;  %vm486_vm0 = vmmov 0   ;;  %v487_v13 = vmov 0.0   ;;  %v59_v17 = vand.u32 127, %v58_v14  ;;  %vm118_vm9 = vcmask 130048   ;;  %v195_v45 = vld [vmem:[#allocation7 + $0x18] sm:$0xff]  ;;  %s488_s26 = smov [#allocation8]  }
  0x3a   :  { %343 = vmatpush3.bf16.msra.mxu0 %v342_v11  ;;  %327 = vmatprep.mubr.msk.f32.mxu0 %vm486_vm0, %v487_v13  ;;  %v345_v44 = vpack.c.bf16 %v193_v42, %v192_v41  ;;  %v348_v46 = vpack.c.bf16 %v195_v45, %v194_v43  ;;  %vm204_vm10 = vcmask 261120   ;;  %v200_v50 = vshrl.u32 %v58_v14, 7  ;;  %v196_v51 = vld [vmem:[%s574_s3] sm:$0x1]  ;;  %s295_s27 = sshll.u32 %s488_s26, 4  ;;  %s296_s27 = int_to_ptr.vmem [resolvable:$true] %s295_s27 }
  0x3b   :  { %338 = vmatprep.mubr.msk.f32.mxu1 %vm486_vm0, %v487_v13  ;;  %v197_v52 = vmul.f32 8.0, %v196_v51  ;;  %vm287_vm11 = vcmask 517120   ;;  %s444_s28 = scalar_lea.vmem %s296_s27, 32  ;;  %p449_p11 = scmp.lt.s32.totalorder %s296_s27, %s296_s27 }
  0x3c   :  { %370 = vset.pattern.permute.xlu1 %v479_v3  ;;  %368 = vset.pattern.permute.xlu0 %v480_v4  ;;  %v201_v53 = vsub.s32 0, %v200_v50  ;;  %p445_p10 = scmp.ne.s32.totalorder %s296_s27, %s444_s28  ;;  %p450_p12 = scmp.lt.s32.totalorder %s444_s28, %s444_s28 }
  0x3d   :  { %82 = vperm.xlu1 %370, %v57_v2   ;;  %68 = vperm.xlu0 %368, %v57_v2  }
  0x3e   :  { %346 = vmatpush3.bf16.msra.mxu1 %v345_v44  ;;  %v202_v54 = vrot.slane %v197_v52, %v201_v53  ;;  %p451_p13 = por %p450_p12, %p449_p11 }
  0x3f   :  { %347 = vmatprep.subr.bf16.mxu1 %v485_v12 }
  0x40   :  { %p452_p0 = pnand %p451_p13, %p445_p10 }
  0x41   :  { %371 = vset.pattern.permute.xlu1 %v481_v5  ;;  %372 = vset.pattern.permute.xlu0 %v482_v6 }
  0x42   :  { %89 = vperm.xlu1 %371, %v57_v2   ;;  %96 = vperm.xlu0 %372, %v57_v2  }
  0x43   :  { %349 = vmatpush3.bf16.msra.mxu1 %v348_v46 }
  0x46   :  { %373 = vset.pattern.permute.xlu1 %v483_v7  ;;  %375 = vset.pattern.permute.xlu0 %v478_v1 }
  0x47   :  { %103 = vperm.xlu1 %373, %v57_v2  }
  0x4b   :  { %374 = vset.pattern.permute.xlu1 %v484_v10 }
  0x4c   :  { %110 = vperm.xlu1 %374, %v57_v2  }
  0xb7   :  { %v76_v15 = vpop.permute.xlu1 %75  ;;  %v62_v16 = vpop.permute.xlu0 %61 }
  0xb8   :  { %vm63_vm1 = vcmp.eq.s32.totalorder %v62_v16, %v59_v17  ;;  %vm77_vm2 = vcmp.eq.s32.totalorder %v76_v15, %v59_v17 }
  0xb9   :  { %v305_v20 = vsel %vm63_vm1, 1.0, %v487_v13  ;;  %v307_v23 = vsel %vm77_vm2, 1.0, %v487_v13 }
  0xbc   :  { %v83_v18 = vpop.permute.xlu1 %82  ;;  %v69_v19 = vpop.permute.xlu0 %68 }
  0xbd   :  { %vm70_vm3 = vcmp.eq.s32.totalorder %v69_v19, %v59_v17  ;;  %vm84_vm4 = vcmp.eq.s32.totalorder %v83_v18, %v59_v17 }
  0xbe   :  { %v306_v21 = vsel %vm70_vm3, 1.0, %v487_v13  ;;  %v308_v27 = vsel %vm84_vm4, 1.0, %v487_v13 }
  0xbf   :  { %v73_v22 = vadd.f32 %v306_v21, %v305_v20 }
  0xc1   :  { %v80_v24 = vadd.f32 %v307_v23, %v73_v22  ;;  %v90_v25 = vpop.permute.xlu1 %89  ;;  %v97_v26 = vpop.permute.xlu0 %96 }
  0xc2   :  { %vm91_vm5 = vcmp.eq.s32.totalorder %v90_v25, %v59_v17  ;;  %vm98_vm6 = vcmp.eq.s32.totalorder %v97_v26, %v59_v17 }
  0xc3   :  { %v87_v28 = vadd.f32 %v308_v27, %v80_v24  ;;  %v309_v29 = vsel %vm91_vm5, 1.0, %v487_v13  ;;  %v310_v31 = vsel %vm98_vm6, 1.0, %v487_v13 }
  0xc5   :  { %v94_v30 = vadd.f32 %v309_v29, %v87_v28 }
  0xc6   :  { %v104_v32 = vpop.permute.xlu1 %103 }
  0xc7   :  { %vm105_vm7 = vcmp.eq.s32.totalorder %v104_v32, %v59_v17  ;;  %v101_v33 = vadd.f32 %v310_v31, %v94_v30 }
  0xc8   :  { %v311_v34 = vsel %vm105_vm7, 1.0, %v487_v13 }
  0xc9   :  { %v108_v36 = vadd.f32 %v311_v34, %v101_v33 }
  0xcb   :  { %v111_v35 = vpop.permute.xlu1 %110 }
  0xcc   :  { %vm112_vm8 = vcmp.eq.s32.totalorder %v111_v35, %v59_v17 }
  0xcd   :  { %v312_v37 = vsel %vm112_vm8, 1.0, %v487_v13 }
  0xce   :  { %v115_v38 = vadd.f32 %v312_v37, %v108_v36 }
  0xd0   :  { %328 = vmatmul.mubr.msk.f32.vlgmr.msra.gmra.mrb[0].mxu0 %vm118_vm9, %v115_v38  ;;  %v278_v39 = vsub.f32 8.0, %v115_v38 }
  0xd2   :  { %v279_v40 = vmax.f32 %v278_v39, 1.0 }
  0xd4   :  { %282 = vperm.xlu0 %375, %v279_v40  }
 0x153   :  { %v283_v49 = vpop.permute.xlu0 %282 }
 0x154   :  { %376 = vrcp.f32 %v283_v49 }
 0x15e   :  { %v377_v58 = vpop.eup %376 }
 0x1a3   :  { %v188_v47 = vpop.f32.mrb[0].mxu0 }
 0x1a4   :  { %v329_v48 = vpop.f32.mrb[1].mxu0  ;;  %339 = vmatmul.mubr.msk.f32.vlgmr.msra.gmra.mrb[0].mxu1 %vm204_vm10, %v188_v47 }
 0x277   :  { %v274_v55 = vpop.f32.mrb[0].mxu1 }
 0x278   :  { %v275_v56 = vadd.f32 %v274_v55, %v202_v54  ;;  %v340_v57 = vpop.f32.mrb[1].mxu1 }
 0x27a   :  { %v286_v59 = vmul.f32 %v377_v58, %v275_v56 }
 0x27c   :  { %288 = vst.msk [vmem:[#allocation8] sm:$0x3] %vm287_vm11, %v286_v59 }
 0x27d   :  { %455 = shalt.err (!%p452_p0)
}
 0x27e   :  { %s456_s30 = scalar_lea.hbm %s575_s4, 32 }
 0x27f   :  { %p457_p1 = scmp.ne.s32.totalorder %s575_s4, %s456_s30  ;;  %p460_p2 = scmp.lt.u32.totalorder %s456_s30, %s575_s4 }
 0x281   :  { %p462_p3 = pnand %p460_p2, %p457_p1 }
 0x283   :  { %465 = shalt.err (!%p462_p3)
}
 0x284   :  { %298 = dma.vmem_to_hbm [thread:$0]  %s296_s27, 32, %s575_s4, [#allocation4]  }
 0x285   :  { %470 = dma.done.wait [#allocation4], 32  }
 0x286   :  { %471 = vsyncadd [#allocation4], 4294967264 }
 0x287   :  { %302 = vsyncpa [#allocation3], 1 }
 0x288   :  { %303 = vsyncpa [#allocation6], 1 }
 0x289   :  { %304 = vsyncpa [#allocation4], 1 }

</bundles_post_ra>
